<compile_context>
chip_gen: v7x
topology: tpu7x:2x2x1
jax: 0.10.0
libtpu: 0.0.40
codegen_flags: <defaults>
</compile_context>

<pallas_src>
import jax
import jax.numpy as jnp
from jax.experimental import pallas as pl
from jax.experimental.pallas import tpu as pltpu


def _cat_generator_kernel(xn_ref, xc_ref,
                          w1_ref, b1_ref,
                          w2_ref, b2_ref,
                          w3_ref, b3_ref,
                          e_ref, r_ref,
                          o_ref):
    x = xn_ref[...].astype(jnp.float32)                                # [TB, xdim]

    # Layer 1 (all cats fused on the N dim): Linear + LeakyReLU(0.01)
    h = jnp.dot(x, w1_ref[...], preferred_element_type=jnp.float32) + b1_ref[...]
    h = jnp.where(h > 0, h, 0.01 * h)                                  # [TB, C*hdim]

    # Hidden layer (block-diagonal): Linear + LeakyReLU(0.01)
    h = jnp.dot(h, w2_ref[...], preferred_element_type=jnp.float32) + b2_ref[...]
    h = jnp.where(h > 0, h, 0.01 * h)                                  # [TB, C*hdim]

    # Output layer (block-diagonal): Linear + Tanh
    y = jnp.dot(h, w3_ref[...], preferred_element_type=jnp.float32) + b3_ref[...]
    y = jnp.tanh(y)                                                    # [TB, C*ydim]

    # Weighted reduction over categories without any reshape:
    #   out[:, j] = sum_c xc[:, c] * y[:, c*ydim + j]
    wx = jnp.dot(xc_ref[...].astype(jnp.float32), e_ref[...],
                 preferred_element_type=jnp.float32)                   # [TB, C*ydim]
    out = jnp.dot(wx * y, r_ref[...], preferred_element_type=jnp.float32)
    o_ref[...] = out.astype(o_ref.dtype)                               # [TB, ydim]


def pack_params(params, *, xdim, hdim, ydim, n_cats):
    """One-time packing of stacked per-category weights into fused matrices."""
    w1, b1, w2, b2, w3, b3 = params
    # w1: [C, xdim, hdim] -> [xdim, C*hdim]
    W1 = jnp.transpose(w1, (1, 0, 2)).reshape(xdim, n_cats * hdim)
    B1 = b1.reshape(1, n_cats * hdim)
    # Block-diagonal hidden / output layers.
    W2 = jax.scipy.linalg.block_diag(*[w2[c] for c in range(n_cats)])   # [C*h, C*h]
    B2 = b2.reshape(1, n_cats * hdim)
    W3 = jax.scipy.linalg.block_diag(*[w3[c] for c in range(n_cats)])   # [C*h, C*y]
    B3 = b3.reshape(1, n_cats * ydim)
    # Constant expand / block-sum matrices for the weighted category reduction.
    E = jnp.kron(jnp.eye(n_cats, dtype=jnp.float32),
                 jnp.ones((1, ydim), jnp.float32))                      # [C, C*y]
    R = jnp.kron(jnp.ones((n_cats, 1), jnp.float32),
                 jnp.eye(ydim, dtype=jnp.float32))                      # [C*y, y]
    return (W1, B1, W2, B2, W3, B3, E, R)


def cat_generator_forward(x, packed, *, xdim, hdim, ydim, n_cats, max_block_b=512):
    """x: [B, xdim + n_cats] -> [B, ydim]."""
    B = x.shape[0]
    CH = n_cats * hdim
    CY = n_cats * ydim
    W1, B1, W2, B2, W3, B3, E, R = packed

    # Batch tiling: single tile for small B, else 512-row (multiple-of-8) tiles.
    if B <= max_block_b:
        tb, b_pad = B, B
    else:
        tb = max_block_b
        b_pad = pl.cdiv(B, tb) * tb

    x_noise = x[:, :xdim]
    x_cat = x[:, xdim:]
    if b_pad != B:
        pad = ((0, b_pad - B), (0, 0))
        x_noise = jnp.pad(x_noise, pad)
        x_cat = jnp.pad(x_cat, pad)

    grid_spec = pltpu.PrefetchScalarGridSpec(
        num_scalar_prefetch=0,
        grid=(b_pad // tb,),
        in_specs=[
            pl.BlockSpec((tb, xdim),   lambda i: (i, 0)),
            pl.BlockSpec((tb, n_cats), lambda i: (i, 0)),
            # Weights are resident across batch tiles (same block every step).
            pl.BlockSpec((xdim, CH),   lambda i: (0, 0)),
            pl.BlockSpec((1, CH),      lambda i: (0, 0)),
            pl.BlockSpec((CH, CH),     lambda i: (0, 0)),
            pl.BlockSpec((1, CH),      lambda i: (0, 0)),
            pl.BlockSpec((CH, CY),     lambda i: (0, 0)),
            pl.BlockSpec((1, CY),      lambda i: (0, 0)),
            pl.BlockSpec((n_cats, CY), lambda i: (0, 0)),
            pl.BlockSpec((CY, ydim),   lambda i: (0, 0)),
        ],
        out_specs=pl.BlockSpec((tb, ydim), lambda i: (i, 0)),
    )

    out = pl.pallas_call(
        _cat_generator_kernel,
        out_shape=jax.ShapeDtypeStruct((b_pad, ydim), x.dtype),
        grid_spec=grid_spec,
        compiler_params=pltpu.CompilerParams(
            dimension_semantics=("parallel",)),
    )(x_noise, x_cat, W1, B1, W2, B2, W3, B3, E, R)

    return out[:B]


def init_params(key, *, xdim, hdim, ydim, n_cats):
    """Deterministic synthetic weights, stacked over categories (PyTorch layout)."""
    ks = jax.random.split(key, 6)
    scale = 0.3
    w1 = scale * jax.random.normal(ks[0], (n_cats, xdim, hdim), jnp.float32)
    b1 = scale * jax.random.normal(ks[1], (n_cats, 1, hdim), jnp.float32)
    w2 = scale * jax.random.normal(ks[2], (n_cats, hdim, hdim), jnp.float32)
    b2 = scale * jax.random.normal(ks[3], (n_cats, 1, hdim), jnp.float32)
    w3 = scale * jax.random.normal(ks[4], (n_cats, hdim, ydim), jnp.float32)
    b3 = scale * jax.random.normal(ks[5], (n_cats, 1, ydim), jnp.float32)
    return (w1, b1, w2, b2, w3, b3)


def reference_forward(x, params, *, xdim, n_cats):
    """Pure-JAX reference mirroring the PyTorch forward (per-cat nets)."""
    w1, b1, w2, b2, w3, b3 = params
    xn = x[:, :xdim]
    xc = x[:, xdim:]
    outs = []
    for c in range(n_cats):
        h = xn @ w1[c] + b1[c]
        h = jnp.where(h > 0, h, 0.01 * h)
        h = h @ w2[c] + b2[c]
        h = jnp.where(h > 0, h, 0.01 * h)
        y = jnp.tanh(h @ w3[c] + b3[c])
        outs.append(y[:, None, :])
    outs = jnp.concatenate(outs, axis=1)          # [B, n_cats, ydim]
    return (xc[:, :, None] * outs).sum(axis=1)    # [B, ydim]


if __name__ == "__main__":
    B, xdim, hdim, ydim, n_cats = 8, 8, 32, 16, 3

    key = jax.random.PRNGKey(0)
    kx, kp = jax.random.split(key)
    x = jax.random.normal(kx, (B, xdim + n_cats), jnp.float32)
    params = init_params(kp, xdim=xdim, hdim=hdim, ydim=ydim, n_cats=n_cats)
    packed = pack_params(params, xdim=xdim, hdim=hdim, ydim=ydim, n_cats=n_cats)

    out = cat_generator_forward(x, packed, xdim=xdim, hdim=hdim,
                                ydim=ydim, n_cats=n_cats)
    out = jax.block_until_ready(out)

    ref = reference_forward(x, params, xdim=xdim, n_cats=n_cats)
    assert out.shape == (B, ydim)
    assert jnp.allclose(out, ref, atol=1e-5, rtol=1e-5), "mismatch vs reference"

    print("KERNEL_OK")
</pallas_src>

<mosaic_0001>
module attributes {stable_mosaic.version = 11 : i64} {
  func.func @_cat_generator_kernel(%arg0: i32, %arg1: memref<8x8xf32, #tpu.memory_space<vmem>>, %arg2: memref<8x3xf32, #tpu.memory_space<vmem>>, %arg3: memref<8x96xf32, #tpu.memory_space<vmem>>, %arg4: memref<1x96xf32, #tpu.memory_space<vmem>>, %arg5: memref<96x96xf32, #tpu.memory_space<vmem>>, %arg6: memref<1x96xf32, #tpu.memory_space<vmem>>, %arg7: memref<96x48xf32, #tpu.memory_space<vmem>>, %arg8: memref<1x48xf32, #tpu.memory_space<vmem>>, %arg9: memref<3x48xf32, #tpu.memory_space<vmem>>, %arg10: memref<48x16xf32, #tpu.memory_space<vmem>>, %arg11: memref<8x16xf32, #tpu.memory_space<vmem>>) attributes {dimension_semantics = [#tpu.dimension_semantics<parallel>], iteration_bounds = array<i64: 1>, scalar_prefetch = 0 : i64, scratch_operands = 0 : i64, tpu.core_type = #tpu.core_type<tc>, window_params = [{transform_indices = @transform_0, window_bounds = array<i64: 8, 8>}, {transform_indices = @transform_1, window_bounds = array<i64: 8, 3>}, {pipeline_mode = #tpu.pipeline_mode<synchronous>, transform_indices = @transform_2, window_bounds = array<i64: 8, 96>}, {pipeline_mode = #tpu.pipeline_mode<synchronous>, transform_indices = @transform_3, window_bounds = array<i64: 1, 96>}, {pipeline_mode = #tpu.pipeline_mode<synchronous>, transform_indices = @transform_4, window_bounds = array<i64: 96, 96>}, {pipeline_mode = #tpu.pipeline_mode<synchronous>, transform_indices = @transform_5, window_bounds = array<i64: 1, 96>}, {pipeline_mode = #tpu.pipeline_mode<synchronous>, transform_indices = @transform_6, window_bounds = array<i64: 96, 48>}, {pipeline_mode = #tpu.pipeline_mode<synchronous>, transform_indices = @transform_7, window_bounds = array<i64: 1, 48>}, {pipeline_mode = #tpu.pipeline_mode<synchronous>, transform_indices = @transform_8, window_bounds = array<i64: 3, 48>}, {pipeline_mode = #tpu.pipeline_mode<synchronous>, transform_indices = @transform_9, window_bounds = array<i64: 48, 16>}, {transform_indices = @transform_10, window_bounds = array<i64: 8, 16>}]} {
    %c0 = arith.constant 0 : index
    %c0_0 = arith.constant 0 : index
    %0 = vector.load %arg1[%c0, %c0_0] : memref<8x8xf32, #tpu.memory_space<vmem>>, vector<8x8xf32>
    %c0_1 = arith.constant 0 : index
    %c0_2 = arith.constant 0 : index
    %1 = vector.load %arg3[%c0_1, %c0_2] : memref<8x96xf32, #tpu.memory_space<vmem>>, vector<8x96xf32>
    %cst = arith.constant dense<0.000000e+00> : vector<8x96xf32>
    %2 = tpu.matmul %0, %1, %cst {dimension_numbers = #tpu.dot_dimension_numbers<[1], [0], [0], [1], [0, 0, 1, 1], [], []>} : vector<8x8xf32>, vector<8x96xf32>, vector<8x96xf32> -> vector<8x96xf32>
    %c0_3 = arith.constant 0 : index
    %c0_4 = arith.constant 0 : index
    %3 = vector.load %arg4[%c0_3, %c0_4] : memref<1x96xf32, #tpu.memory_space<vmem>>, vector<1x96xf32>
    %4 = vector.broadcast %3 : vector<1x96xf32> to vector<8x96xf32>
    %5 = arith.addf %2, %4 : vector<8x96xf32>
    %cst_5 = arith.constant 0.000000e+00 : f32
    %6 = vector.broadcast %cst_5 : f32 to vector<8x96xf32>
    %7 = arith.cmpf ogt, %5, %6 : vector<8x96xf32>
    %cst_6 = arith.constant 0.00999999977 : f32
    %8 = vector.broadcast %cst_6 : f32 to vector<8x96xf32>
    %9 = arith.mulf %8, %5 : vector<8x96xf32>
    %10 = arith.select %7, %5, %9 : vector<8x96xi1>, vector<8x96xf32>
    %c0_7 = arith.constant 0 : index
    %c0_8 = arith.constant 0 : index
    %11 = vector.load %arg5[%c0_7, %c0_8] : memref<96x96xf32, #tpu.memory_space<vmem>>, vector<96x96xf32>
    %cst_9 = arith.constant dense<0.000000e+00> : vector<8x96xf32>
    %12 = tpu.matmul %10, %11, %cst_9 {dimension_numbers = #tpu.dot_dimension_numbers<[1], [0], [0], [1], [0, 0, 1, 1], [], []>} : vector<8x96xf32>, vector<96x96xf32>, vector<8x96xf32> -> vector<8x96xf32>
    %c0_10 = arith.constant 0 : index
    %c0_11 = arith.constant 0 : index
    %13 = vector.load %arg6[%c0_10, %c0_11] : memref<1x96xf32, #tpu.memory_space<vmem>>, vector<1x96xf32>
    %14 = vector.broadcast %13 : vector<1x96xf32> to vector<8x96xf32>
    %15 = arith.addf %12, %14 : vector<8x96xf32>
    %cst_12 = arith.constant 0.000000e+00 : f32
    %16 = vector.broadcast %cst_12 : f32 to vector<8x96xf32>
    %17 = arith.cmpf ogt, %15, %16 : vector<8x96xf32>
    %cst_13 = arith.constant 0.00999999977 : f32
    %18 = vector.broadcast %cst_13 : f32 to vector<8x96xf32>
    %19 = arith.mulf %18, %15 : vector<8x96xf32>
    %20 = arith.select %17, %15, %19 : vector<8x96xi1>, vector<8x96xf32>
    %c0_14 = arith.constant 0 : index
    %c0_15 = arith.constant 0 : index
    %21 = vector.load %arg7[%c0_14, %c0_15] : memref<96x48xf32, #tpu.memory_space<vmem>>, vector<96x48xf32>
    %cst_16 = arith.constant dense<0.000000e+00> : vector<8x48xf32>
    %22 = tpu.matmul %20, %21, %cst_16 {dimension_numbers = #tpu.dot_dimension_numbers<[1], [0], [0], [1], [0, 0, 1, 1], [], []>} : vector<8x96xf32>, vector<96x48xf32>, vector<8x48xf32> -> vector<8x48xf32>
    %c0_17 = arith.constant 0 : index
    %c0_18 = arith.constant 0 : index
    %23 = vector.load %arg8[%c0_17, %c0_18] : memref<1x48xf32, #tpu.memory_space<vmem>>, vector<1x48xf32>
    %24 = vector.broadcast %23 : vector<1x48xf32> to vector<8x48xf32>
    %25 = arith.addf %22, %24 : vector<8x48xf32>
    %26 = math.tanh %25 : vector<8x48xf32>
    %c0_19 = arith.constant 0 : index
    %c0_20 = arith.constant 0 : index
    %27 = vector.load %arg2[%c0_19, %c0_20] : memref<8x3xf32, #tpu.memory_space<vmem>>, vector<8x3xf32>
    %c0_21 = arith.constant 0 : index
    %c0_22 = arith.constant 0 : index
    %28 = vector.load %arg9[%c0_21, %c0_22] : memref<3x48xf32, #tpu.memory_space<vmem>>, vector<3x48xf32>
    %cst_23 = arith.constant dense<0.000000e+00> : vector<8x48xf32>
    %29 = tpu.matmul %27, %28, %cst_23 {dimension_numbers = #tpu.dot_dimension_numbers<[1], [0], [0], [1], [0, 0, 1, 1], [], []>} : vector<8x3xf32>, vector<3x48xf32>, vector<8x48xf32> -> vector<8x48xf32>
    %30 = arith.mulf %29, %26 : vector<8x48xf32>
    %c0_24 = arith.constant 0 : index
    %c0_25 = arith.constant 0 : index
    %31 = vector.load %arg10[%c0_24, %c0_25] : memref<48x16xf32, #tpu.memory_space<vmem>>, vector<48x16xf32>
    %cst_26 = arith.constant dense<0.000000e+00> : vector<8x16xf32>
    %32 = tpu.matmul %30, %31, %cst_26 {dimension_numbers = #tpu.dot_dimension_numbers<[1], [0], [0], [1], [0, 0, 1, 1], [], []>} : vector<8x48xf32>, vector<48x16xf32>, vector<8x16xf32> -> vector<8x16xf32>
    %c0_27 = arith.constant 0 : index
    %c0_28 = arith.constant 0 : index
    %33 = vector.load %arg11[%c0_27, %c0_28] : memref<8x16xf32, #tpu.memory_space<vmem>>, vector<8x16xf32>
    tpu.vector_store %arg11[%c0_27, %c0_28], %32 {strides = array<i32>} : memref<8x16xf32, #tpu.memory_space<vmem>>, vector<8x16xf32>,
    return
  }
  func.func @transform_0(%arg0: i32) -> (i32, i32) {
    %c0_i32 = arith.constant 0 : i32
    %c0_i32_0 = arith.constant 0 : i32
    return %arg0, %c0_i32 : i32, i32
  }
  func.func @transform_1(%arg0: i32) -> (i32, i32) {
    %c0_i32 = arith.constant 0 : i32
    %c0_i32_0 = arith.constant 0 : i32
    return %arg0, %c0_i32 : i32, i32
  }
  func.func @transform_2(%arg0: i32) -> (i32, i32) {
    %c0_i32 = arith.constant 0 : i32
    %c0_i32_0 = arith.constant 0 : i32
    %c0_i32_1 = arith.constant 0 : i32
    return %c0_i32, %c0_i32_0 : i32, i32
  }
  func.func @transform_3(%arg0: i32) -> (i32, i32) {
    %c0_i32 = arith.constant 0 : i32
    %c0_i32_0 = arith.constant 0 : i32
    %c0_i32_1 = arith.constant 0 : i32
    return %c0_i32, %c0_i32_0 : i32, i32
  }
  func.func @transform_4(%arg0: i32) -> (i32, i32) {
    %c0_i32 = arith.constant 0 : i32
    %c0_i32_0 = arith.constant 0 : i32
    %c0_i32_1 = arith.constant 0 : i32
    return %c0_i32, %c0_i32_0 : i32, i32
  }
  func.func @transform_5(%arg0: i32) -> (i32, i32) {
    %c0_i32 = arith.constant 0 : i32
    %c0_i32_0 = arith.constant 0 : i32
    %c0_i32_1 = arith.constant 0 : i32
    return %c0_i32, %c0_i32_0 : i32, i32
  }
  func.func @transform_6(%arg0: i32) -> (i32, i32) {
    %c0_i32 = arith.constant 0 : i32
    %c0_i32_0 = arith.constant 0 : i32
    %c0_i32_1 = arith.constant 0 : i32
    return %c0_i32, %c0_i32_0 : i32, i32
  }
  func.func @transform_7(%arg0: i32) -> (i32, i32) {
    %c0_i32 = arith.constant 0 : i32
    %c0_i32_0 = arith.constant 0 : i32
    %c0_i32_1 = arith.constant 0 : i32
    return %c0_i32, %c0_i32_0 : i32, i32
  }
  func.func @transform_8(%arg0: i32) -> (i32, i32) {
    %c0_i32 = arith.constant 0 : i32
    %c0_i32_0 = arith.constant 0 : i32
    %c0_i32_1 = arith.constant 0 : i32
    return %c0_i32, %c0_i32_0 : i32, i32
  }
  func.func @transform_9(%arg0: i32) -> (i32, i32) {
    %c0_i32 = arith.constant 0 : i32
    %c0_i32_0 = arith.constant 0 : i32
    %c0_i32_1 = arith.constant 0 : i32
    return %c0_i32, %c0_i32_0 : i32, i32
  }
  func.func @transform_10(%arg0: i32) -> (i32, i32) {
    %c0_i32 = arith.constant 0 : i32
    %c0_i32_0 = arith.constant 0 : i32
    return %arg0, %c0_i32 : i32, i32
  }
}

</mosaic_0001>

<bundles_post_ra>
// kernel: tpu_custom_call.1
= control target key start
LH: loop header
LB: loop body
LE: loop exit
PB: predicated region body
PF: predicated region fallthrough
CT: control target
= control target key end

     0   :  { %vm45_vm0 = vcmask 64512   ;;  %v688_v2 = vmov 0.0   ;;  %vm689_vm1 = vmmov 0   ;;  %v690_v8 = vmov 0.0|0.0   ;;  %s899_s0 = inlined_call_operand.vmem [shape: f32[8,8], index: 0, kind: input, shape index: {}]   ;;  %s900_s1 = inlined_call_operand.vmem [shape: f32[8,3], index: 1, kind: input, shape index: {}]   ;;  %s901_s2 = inlined_call_operand.vmem [shape: f32[8,96], index: 2, kind: input, shape index: {}]   ;;  %s902_s3 = inlined_call_operand.vmem [shape: f32[1,96], index: 3, kind: input, shape index: {}]   ;;  %s903_s4 = inlined_call_operand.vmem [shape: f32[96,96], index: 4, kind: input, shape index: {}]   ;;  %s904_s5 = inlined_call_operand.vmem [shape: f32[1,96], index: 5, kind: input, shape index: {}]   ;;  %s905_s6 = inlined_call_operand.vmem [shape: f32[96,48], index: 6, kind: input, shape index: {}]   ;;  %s906_s7 = inlined_call_operand.vmem [shape: f32[1,48], index: 7, kind: input, shape index: {}]   ;;  %s907_s8 = inlined_call_operand.vmem [shape: f32[3,48], index: 8, kind: input, shape index: {}]   ;;  %s908_s9 = inlined_call_operand.vmem [shape: f32[48,16], index: 9, kind: input, shape index: {}]   ;;  %s909_s10 = inlined_call_operand.hbm [shape: f32[8,16], index: 10, kind: output, shape index: {}]  }
   0x1   :  { %v37_v0 = vld [vmem:[%s901_s2] sm:$0xff]  ;;  %534 = vmatprep.subr.mxu1 %v688_v2  ;;  %536 = vmatprep.mubr.msk.f32.mxu1 %vm689_vm1, %v688_v2  ;;  %v123_v4 = vld [vmem:[%s903_s4 + $0x8] sm:$0xff]  ;;  %v124_v5 = vld [vmem:[%s903_s4 + $0x10] sm:$0xff] }
   0x2   :  { %v36_v1 = vld [vmem:[%s899_s0] sm:$0xff]  ;;  %535 = vmatpush3.msra.mxu1 %v37_v0  ;;  %v125_v7 = vld [vmem:[%s903_s4 + $0x18] sm:$0xff]  ;;  %631 = vmatprep.subr.bf16.mxu0 %v690_v8 }
   0x3   :  { %v122_v3 = vld [vmem:[%s903_s4] sm:$0xff]  ;;  %537 = vmatmul.mubr.msk.f32.vlgmr.msra.gmra.mrb[0].mxu1 %vm45_vm0, %v36_v1  ;;  %613 = vmatprep.subr.bf16.mxu1 %v690_v8  ;;  %v617_v9 = vpack.c.bf16 %v125_v7, %v124_v5 }
   0x4   :  { %v614_v6 = vpack.c.bf16 %v123_v4, %v122_v3  ;;  %563 = vmatprep.mubr.msk.f32.mxu1 %vm689_vm1, %v688_v2 }
   0x6   :  { %615 = vmatpush3.bf16.msra.mxu1 %v614_v6 }
   0x7   :  { %15 = vsyncpa [#allocation3], 0  ;;  %616 = vmatprep.subr.bf16.mxu1 %v690_v8  ;;  %v126_v10 = vld [vmem:[%s903_s4 + $0x20] sm:$0xff]  ;;  %v127_v11 = vld [vmem:[%s903_s4 + $0x28] sm:$0xff]  ;;  %590 = vmatprep.mubr.msk.f32.mxu0 %vm689_vm1, %v688_v2  ;;  %vm141_vm3 = vcmask 785408   ;;  %vm317_vm4 = vcmask 1042432  }
   0x8   :  { %v620_v12 = vpack.c.bf16 %v127_v11, %v126_v10  ;;  %v128_v13 = vld [vmem:[%s903_s4 + $0x30] sm:$0xff]  ;;  %v129_v14 = vld [vmem:[%s903_s4 + $0x38] sm:$0xff]  ;;  %v130_v16 = vld [vmem:[%s903_s4 + $0x40] sm:$0xff]  ;;  %vm313_vm5 = vcmask 23552   ;;  %vm398_vm7 = vcmask 392192   ;;  %s691_s14 = smov [#allocation2]  }
   0x9   :  { %v623_v15 = vpack.c.bf16 %v129_v14, %v128_v13  ;;  %v131_v17 = vld [vmem:[%s903_s4 + $0x48] sm:$0xff]  ;;  %v132_v19 = vld [vmem:[%s903_s4 + $0x50] sm:$0xff]  ;;  %v133_v20 = vld [vmem:[%s903_s4 + $0x58] sm:$0xff]  ;;  %s480_s15 = sshll.u32 %s691_s14, 4  ;;  %vm472_vm8 = vcmask 130048   ;;  %s481_s15 = int_to_ptr.vmem [resolvable:$true] %s480_s15 }
   0xa   :  { %618 = vmatpush3.bf16.msra.mxu1 %v617_v9  ;;  %v626_v18 = vpack.c.bf16 %v131_v17, %v130_v16  ;;  %v629_v21 = vpack.c.bf16 %v133_v20, %v132_v19  ;;  %v218_v22 = vld [vmem:[%s905_s6] sm:$0xff]  ;;  %v219_v23 = vld [vmem:[%s905_s6 + $0x8] sm:$0xff]  ;;  %v220_v24 = vld [vmem:[%s905_s6 + $0x10] sm:$0xff]  ;;  %p669_p1 = scmp.lt.s32.totalorder %s481_s15, %s481_s15 }
   0xb   :  { %619 = vmatprep.subr.bf16.mxu1 %v690_v8  ;;  %v632_v25 = vpack.c.bf16 %v219_v23, %v218_v22  ;;  %v221_v26 = vld [vmem:[%s905_s6 + $0x18] sm:$0xff]  ;;  %v222_v28 = vld [vmem:[%s905_s6 + $0x20] sm:$0xff]  ;;  %v223_v29 = vld [vmem:[%s905_s6 + $0x28] sm:$0xff] }
   0xc   :  { %v635_v27 = vpack.c.bf16 %v221_v26, %v220_v24  ;;  %v638_v30 = vpack.c.bf16 %v223_v29, %v222_v28  ;;  %v224_v31 = vld [vmem:[%s905_s6 + $0x30] sm:$0xff]  ;;  %v225_v32 = vld [vmem:[%s905_s6 + $0x38] sm:$0xff]  ;;  %v226_v34 = vld [vmem:[%s905_s6 + $0x40] sm:$0xff] }
   0xd   :  { %633 = vmatpush3.bf16.msra.mxu0 %v632_v25  ;;  %v641_v33 = vpack.c.bf16 %v225_v32, %v224_v31  ;;  %v227_v35 = vld [vmem:[%s905_s6 + $0x48] sm:$0xff]  ;;  %v488_v37 = vld [vmem:[%s902_s3] ss:$0 sm:$0xff]  ;;  %v228_v43 = vld [vmem:[%s905_s6 + $0x50] sm:$0xff] }
   0xe   :  { %621 = vmatpush3.bf16.msra.mxu1 %v620_v12  ;;  %634 = vmatprep.subr.bf16.mxu0 %v690_v8  ;;  %v644_v36 = vpack.c.bf16 %v227_v35, %v226_v34  ;;  %v229_v44 = vld [vmem:[%s905_s6 + $0x58] sm:$0xff]  ;;  %v312_v46 = vld [vmem:[%s907_s8] sm:$0x7]  ;;  %v393_v55 = vld [vmem:[%s908_s9 + $0x8] sm:$0xff] }
   0xf   :  { %622 = vmatprep.subr.bf16.mxu1 %v690_v8  ;;  %v647_v45 = vpack.c.bf16 %v229_v44, %v228_v43  ;;  %v311_v47 = vld [vmem:[%s900_s1] sm:$0xff]  ;;  %v394_v57 = vld [vmem:[%s908_s9 + $0x10] sm:$0xff]  ;;  %v395_v58 = vld [vmem:[%s908_s9 + $0x18] sm:$0xff] }
  0x10   :  { %v490_v48 = vld [vmem:[%s904_s5] ss:$0 sm:$0xff]  ;;  %v653_v61 = vpack.c.bf16 %v395_v58, %v394_v57  ;;  %v397_v63 = vld [vmem:[%s908_s9 + $0x28] sm:$0xff] }
  0x11   :  { %636 = vmatpush3.bf16.msra.mxu0 %v635_v27  ;;  %v392_v54 = vld [vmem:[%s908_s9] sm:$0xff] }
  0x12   :  { %624 = vmatpush3.bf16.msra.mxu1 %v623_v15  ;;  %637 = vmatprep.subr.bf16.mxu0 %v690_v8  ;;  %v650_v56 = vpack.c.bf16 %v393_v55, %v392_v54  ;;  %v396_v62 = vld [vmem:[%s908_s9 + $0x20] sm:$0xff]  ;;  %s664_s9 = scalar_lea.vmem %s481_s15, 128 }
  0x13   :  { %625 = vmatprep.subr.bf16.mxu1 %v690_v8  ;;  %v656_v0 = vpack.c.bf16 %v397_v63, %v396_v62  ;;  %v492_v1 = vld [vmem:[%s906_s7] ss:$0 sm:$0xff]  ;;  %p665_p0 = scmp.ne.s32.totalorder %s481_s15, %s664_s9  ;;  %p670_p2 = scmp.lt.s32.totalorder %s664_s9, %s664_s9 }
  0x15   :  { %639 = vmatpush3.bf16.msra.mxu0 %v638_v30  ;;  %p671_p3 = por %p670_p2, %p669_p1 }
  0x16   :  { %627 = vmatpush3.bf16.msra.mxu1 %v626_v18  ;;  %640 = vmatprep.subr.bf16.mxu0 %v690_v8 }
  0x17   :  { %628 = vmatprep.subr.bf16.mxu1 %v690_v8  ;;  %p672_p4 = pnand %p671_p3, %p665_p0 }
  0x19   :  { %642 = vmatpush3.bf16.msra.mxu0 %v641_v33 }
  0x1a   :  { %630 = vmatpush3.bf16.msra.mxu1 %v629_v21  ;;  %643 = vmatprep.subr.bf16.mxu0 %v690_v8 }
  0x1b   :  { %593 = vmatprep.subr.mxu1 %v688_v2 }
  0x1d   :  { %645 = vmatpush3.bf16.msra.mxu0 %v644_v36 }
  0x1e   :  { %646 = vmatprep.subr.bf16.mxu0 %v690_v8 }
  0x21   :  { %648 = vmatpush3.bf16.msra.mxu0 %v647_v45 }
  0x22   :  { %649 = vmatprep.subr.bf16.mxu0 %v690_v8 }
  0xd6   :  { %v115_v38 = vpop.f32.mrb[0].mxu1 }
  0xd7   :  { %v116_v39 = vadd.f32 %v488_v37, %v115_v38  ;;  %v538_v40 = vpop.f32.mrb[1].mxu1 }
  0xd9   :  { %vm119_vm2 = vcmp.gt.f32.partialorder %v116_v39, 0.0  ;;  %v120_v41 = vmul.f32 0.01, %v116_v39 }
  0xdb   :  { %v121_v42 = vsel %vm119_vm2, %v116_v39, %v120_v41 }
  0xdc   :  { %564 = vmatmul.mubr.msk.f32.vlgmr.msra.gmra.mrb[2].mxu1 %vm141_vm3, %v121_v42 }
  0xdd   :  { %595 = vmatprep.mubr.msk.f32.mxu1 %vm689_vm1, %v688_v2  ;;  %594 = vmatpush3.msk.msra.mxu1 %vm317_vm4, %v312_v46 }
  0xe0   :  { %596 = vmatmul.mubr.msk.f32.vlgmr.msra.gmra.mrb[4].mxu1 %vm313_vm5, %v311_v47 }
 0x1af   :  { %v211_v49 = vpop.f32.mrb[2].mxu1 }
 0x1b0   :  { %v212_v50 = vadd.f32 %v490_v48, %v211_v49  ;;  %v565_v51 = vpop.f32.mrb[3].mxu1 }
 0x1b2   :  { %vm215_vm6 = vcmp.gt.f32.partialorder %v212_v50, 0.0  ;;  %v216_v52 = vmul.f32 0.01, %v212_v50 }
 0x1b3   :  { %v387_v59 = vpop.f32.mrb[4].mxu1 }
 0x1b4   :  { %v217_v53 = vsel %vm215_vm6, %v212_v50, %v216_v52  ;;  %v597_v60 = vpop.f32.mrb[5].mxu1 }
 0x1b5   :  { %591 = vmatmul.mubr.msk.f32.vlgmr.msra.gmra.mrb[0].mxu0 %vm141_vm3, %v217_v53 }
 0x1b6   :  { %610 = vmatprep.mubr.msk.f32.mxu0 %vm689_vm1, %v688_v2  ;;  %651 = vmatpush3.bf16.msra.mxu0 %v650_v56 }
 0x1b7   :  { %652 = vmatprep.subr.bf16.mxu0 %v690_v8 }
 0x1ba   :  { %654 = vmatpush3.bf16.msra.mxu0 %v653_v61 }
 0x1bb   :  { %655 = vmatprep.subr.bf16.mxu0 %v690_v8 }
 0x1be   :  { %657 = vmatpush3.bf16.msra.mxu0 %v656_v0 }
 0x288   :  { %v306_v2 = vpop.f32.mrb[0].mxu0 }
 0x289   :  { %v307_v3 = vadd.f32 %v492_v1, %v306_v2  ;;  %v592_v4 = vpop.f32.mrb[1].mxu0 }
 0x28b   :  { %662 = vtanh.f32 %v307_v3 }
 0x295   :  { %v663_v5 = vpop.eup %662 }
 0x296   :  { %v391_v6 = vmul.f32 %v663_v5, %v387_v59 }
 0x298   :  { %611 = vmatmul.mubr.msk.f32.vlgmr.msra.gmra.mrb[2].mxu0 %vm398_vm7, %v391_v6 }
 0x36b   :  { %v468_v7 = vpop.f32.mrb[2].mxu0 }
 0x36c   :  { %473 = vst.msk [vmem:[#allocation2] sm:$0xff] %vm472_vm8, %v468_v7  ;;  %v612_v8 = vpop.f32.mrb[3].mxu0 }
 0x36d   :  { %675 = shalt.err (!%p672_p4)
}
 0x36e   :  { %s676_s17 = scalar_lea.hbm %s909_s10, 128 }
 0x36f   :  { %p677_p5 = scmp.ne.s32.totalorder %s909_s10, %s676_s17  ;;  %p680_p6 = scmp.lt.u32.totalorder %s676_s17, %s909_s10 }
 0x371   :  { %p682_p7 = pnand %p680_p6, %p677_p5 }
 0x373   :  { %685 = shalt.err (!%p682_p7)
}
 0x374   :  { %483 = dma.vmem_to_hbm [thread:$0]  %s481_s15, 128, %s909_s10, [#allocation3]  }
 0x375   :  { %686 = dma.done.wait [#allocation3], 128  }
 0x376   :  { %687 = vsyncadd [#allocation3], 4294967168 }
 0x377   :  { %487 = vsyncpa [#allocation3], 1 }

</bundles_post_ra>
